<compile_context>
chip_gen: v5e
topology: v5e:2x2
jax: 0.10.0
libtpu: 0.0.40
codegen_flags: <defaults>
</compile_context>

<pallas_src>
import math

import jax
import jax.numpy as jnp
from jax.experimental import pallas as pl
from jax.experimental.pallas import tpu as pltpu

_LANE = 128      # vreg lane width (last dim)
_SUBLANE = 8     # vreg sublane count (second-to-last dim)


def _round_up(n: int, m: int) -> int:
    return ((n + m - 1) // m) * m


def _cdiv(a: int, b: int) -> int:
    return (a + b - 1) // b


def _vmem_plan():
    """Generation-aware (tile-selection budget, compiler vmem limit) in bytes."""
    try:
        cap = int(pltpu.get_tpu_info().vmem_capacity_bytes)
    except Exception:
        cap = 64 * 1024 * 1024                       # conservative (v7x-sized) default
    if cap <= 64 * 1024 * 1024:                      # v7x-class part: 64 MiB per core
        return 32 * 1024 * 1024, 48 * 1024 * 1024
    return 96 * 1024 * 1024, 112 * 1024 * 1024       # v5e / v6e: 128 MiB physical


def _ffn_kernel(x_ref, w1_ref, b1_ref, w2_ref, b2_ref, o_ref, acc_ref):
    """One (batch-tile, M-block) grid step of relu(x @ W1 + b1) @ W2 + b2."""
    m = pl.program_id(1)

    @pl.when(m == 0)
    def _init():
        acc_ref[...] = jnp.zeros_like(acc_ref)

    # hidden block: relu(x @ W1[:, mblk] + b1[mblk]).  MXU operands are the weights'
    # (pre-cast) dtype with f32 accumulation; bias-add / relu stay f32 on the VPU.
    x = x_ref[...].astype(w1_ref.dtype)
    h = jnp.dot(x, w1_ref[...], preferred_element_type=jnp.float32)
    h = jnp.maximum(h + b1_ref[...], 0.0)

    # out += hidden_block @ W2[mblk, :]  (exact: relu is elementwise over M)
    acc_ref[...] += jnp.dot(h.astype(w2_ref.dtype), w2_ref[...],
                            preferred_element_type=jnp.float32)

    @pl.when(m == pl.num_programs(1) - 1)
    def _finalize():
        o_ref[...] = (acc_ref[...] + b2_ref[...]).astype(o_ref.dtype)


def make_ffn(w1, b1, w2, b2, *, compute_dtype=jnp.float32, block_b=None,
             block_m=None, out_dtype=None):
    """Build a fused FFN forward: y = relu(x @ w1 + b1) @ w2 + b2.

    w1: (S, M), w2: (M, A) — already transposed to (in, out) vs torch nn.Linear.
    b1: (M,) or (1, M); b2: (A,) or (1, A).
    compute_dtype: MXU operand dtype (bf16 is beneficial on v5e/v6e/v7x alike;
    accumulation, bias-add, relu and the final store stay in f32 / output dtype).
    Weights/biases are padded + cast here, once, outside the per-call hot path.
    """
    S, M = w1.shape
    Mw2, A = w2.shape
    assert Mw2 == M, "w1/w2 inner dimensions disagree"

    compute_dtype = jnp.dtype(compute_dtype)
    wbytes = compute_dtype.itemsize
    vmem_budget, vmem_limit = _vmem_plan()

    # Lane-dense (128) padding only for feature dims >= 128; small dims use
    # full-array-dim blocks (no padding, no extra HBM passes).
    Ap = _round_up(A, _LANE) if A >= _LANE else A

    if M >= _LANE:
        tm = _round_up(M, _LANE)
        if block_m is not None:
            tm = max(_LANE, min(tm, _round_up(block_m, _LANE)))
    else:
        tm = M

    if block_b is None:
        block_b = 1024 if vmem_budget > 64 * 1024 * 1024 else 256
    tb = _round_up(block_b, _SUBLANE)

    def _vmem_estimate(tb_, tm_):
        # Double-buffered x/out tiles, (conservatively double-buffered) weight
        # blocks, f32 hidden + accumulator, and the in-kernel bf16 cast copies.
        cast = (tb_ * S + tb_ * tm_) * wbytes if wbytes != 4 else 0
        return (2 * tb_ * S * 4                       # x tile (f32 worst case)
                + 2 * (S * tm_ + tm_ * Ap) * wbytes   # W1/W2 blocks
                + 2 * (tm_ + Ap) * 4                  # bias blocks (f32)
                + tb_ * tm_ * 4                       # hidden block (f32)
                + cast                                # x/h bf16 cast copies
                + tb_ * Ap * 4                        # f32 accumulator scratch
                + 2 * tb_ * Ap * 4)                   # out tile

    # Shrink the M-block first (keeps the batch tile large -> better MXU/pipeline
    # efficiency), then the batch tile, until the footprint fits the budget.
    while _vmem_estimate(tb, tm) > vmem_budget:
        if M >= _LANE and tm > _LANE:
            tm = max(_LANE, _round_up(tm // 2, _LANE))
        elif tb > _SUBLANE:
            tb = max(_SUBLANE, _round_up(tb // 2, _SUBLANE))
        else:
            break
    tb_max = tb

    Mp = _round_up(M, tm)
    n_m = Mp // tm

    # Pad + cast parameters once (outside the hot path).  Zero padding is exact:
    # padded M columns give relu(0 + 0) = 0 and hit zero rows of W2; padded A
    # columns (only when A >= 128) are sliced off after the call.
    w1p = jnp.pad(w1.astype(compute_dtype), ((0, 0), (0, Mp - M)))
    b1p = jnp.pad(jnp.asarray(b1, jnp.float32).reshape(1, -1), ((0, 0), (0, Mp - M)))
    w2p = jnp.pad(w2.astype(compute_dtype), ((0, Mp - M), (0, Ap - A)))
    b2p = jnp.pad(jnp.asarray(b2, jnp.float32).reshape(1, -1), ((0, 0), (0, Ap - A)))

    # Single-buffer the weight/bias blocks only when they are grid-invariant
    # (n_m == 1): their second pipeline buffer would be pure VMEM waste.
    state = {"single_buffer": n_m == 1 and hasattr(pl, "Buffered")}
    call_cache = {}

    def _build(tb_, Bp_, o_dtype, single_buffer):
        key = (tb_, Bp_, jnp.dtype(o_dtype).name, single_buffer)
        if key in call_cache:
            return call_cache[key]

        def wspec(shape, index_map):
            if single_buffer:
                return pl.BlockSpec(shape, index_map, pipeline_mode=pl.Buffered(1))
            return pl.BlockSpec(shape, index_map)

        fn = pl.pallas_call(
            _ffn_kernel,
            out_shape=jax.ShapeDtypeStruct((Bp_, Ap), o_dtype),
            grid_spec=pltpu.PrefetchScalarGridSpec(
                num_scalar_prefetch=0,
                grid=(Bp_ // tb_, n_m),                            # batch tiles x M blocks
                in_specs=[
                    pl.BlockSpec((tb_, S), lambda i, m: (i, 0)),   # x: tiled over batch
                    wspec((S, tm), lambda i, m: (0, m)),           # W1 M-block
                    wspec((1, tm), lambda i, m: (0, m)),           # b1 M-block
                    wspec((tm, Ap), lambda i, m: (m, 0)),          # W2 M-block
                    wspec((1, Ap), lambda i, m: (0, 0)),           # b2 (constant)
                ],
                out_specs=pl.BlockSpec((tb_, Ap), lambda i, m: (i, 0)),
                scratch_shapes=[pltpu.VMEM((tb_, Ap), jnp.float32)],
            ),
            compiler_params=pltpu.CompilerParams(
                dimension_semantics=("parallel", "arbitrary"),
                vmem_limit_bytes=vmem_limit,
            ),
        )
        call_cache[key] = fn
        return fn

    def apply(x):
        B, Sx = x.shape
        assert Sx == S, "state dim mismatch"
        o_dtype = jnp.dtype(out_dtype) if out_dtype is not None else x.dtype

        tb_ = min(tb_max, _round_up(B, _SUBLANE))
        # Give v7x's two TensorCores at least 2 batch tiles to split when B allows.
        if _cdiv(B, tb_) < 2 and B > 2 * _SUBLANE:
            tb_ = max(_SUBLANE, _round_up(_cdiv(B, 2), _SUBLANE))
        Bp_ = _round_up(B, tb_)
        xp = x if Bp_ == B else jnp.pad(x, ((0, Bp_ - B), (0, 0)))

        if state["single_buffer"]:
            try:
                out = jax.block_until_ready(
                    _build(tb_, Bp_, o_dtype, True)(xp, w1p, b1p, w2p, b2p))
            except Exception:
                # This JAX build doesn't lower Buffered(1); fall back to defaults.
                state["single_buffer"] = False
                call_cache.clear()
                out = _build(tb_, Bp_, o_dtype, False)(xp, w1p, b1p, w2p, b2p)
        else:
            out = _build(tb_, Bp_, o_dtype, False)(xp, w1p, b1p, w2p, b2p)

        if Bp_ != B or Ap != A:
            out = out[:B, :A]
        return out

    return apply


def ffn_reference(x, w1, b1, w2, b2, compute_dtype=jnp.float32):
    """Plain-JAX reference with the same dtype policy as the kernel."""
    h = jnp.dot(x.astype(compute_dtype), w1.astype(compute_dtype),
                preferred_element_type=jnp.float32)
    h = jnp.maximum(h + jnp.asarray(b1, jnp.float32).reshape(1, -1), 0.0)
    y = jnp.dot(h.astype(compute_dtype), w2.astype(compute_dtype),
                preferred_element_type=jnp.float32)
    return (y + jnp.asarray(b2, jnp.float32).reshape(1, -1)).astype(x.dtype)


def xavier_uniform(key, fan_in, fan_out, shape, dtype=jnp.float32):
    # matches torch.nn.init.xavier_uniform_ (gain=1)
    bound = math.sqrt(6.0 / (fan_in + fan_out))
    return jax.random.uniform(key, shape, dtype=dtype, minval=-bound, maxval=bound)


if __name__ == "__main__":
    # Small config consistent with the DQN FFN forward.
    state_space_size, mid_dim, action_space_size, batch = 32, 64, 16, 8

    key = jax.random.PRNGKey(0)
    (k_x, k_w1, k_b1, k_w2, k_b2,
     k_x2, k_w1b, k_b1b, k_w2b, k_b2b) = jax.random.split(key, 10)

    # Parameters stored transposed to (in, out) relative to torch nn.Linear.
    w1 = xavier_uniform(k_w1, state_space_size, mid_dim, (state_space_size, mid_dim))
    b1 = (jax.random.uniform(k_b1, (mid_dim,), minval=-1.0, maxval=1.0)
          / math.sqrt(state_space_size)).astype(jnp.float32)
    w2 = xavier_uniform(k_w2, mid_dim, action_space_size, (mid_dim, action_space_size))
    b2 = (jax.random.uniform(k_b2, (action_space_size,), minval=-1.0, maxval=1.0)
          / math.sqrt(mid_dim)).astype(jnp.float32)
    x = jax.random.normal(k_x, (batch, state_space_size), dtype=jnp.float32)

    # f32 path: matches the PyTorch-equivalent math.
    ffn_f32 = make_ffn(w1, b1, w2, b2, compute_dtype=jnp.float32)
    out_f32 = jax.block_until_ready(ffn_f32(x))
    ref_f32 = ffn_reference(x, w1, b1, w2, b2, jnp.float32)
    assert out_f32.shape == (batch, action_space_size)
    assert jnp.allclose(out_f32, ref_f32, atol=1e-5, rtol=1e-5)

    # bf16-operand path (weights pre-cast once; f32 accumulation / bias / relu).
    ffn_bf16 = make_ffn(w1, b1, w2, b2, compute_dtype=jnp.bfloat16)
    out_bf16 = jax.block_until_ready(ffn_bf16(x))
    ref_bf16 = ffn_reference(x, w1, b1, w2, b2, jnp.bfloat16)
    assert jnp.allclose(out_bf16, ref_bf16, atol=2e-2, rtol=2e-2)

    # Larger config exercising the M-reduction grid axis (weights streamed in
    # 128-wide blocks with the f32 accumulator) and a 2-tile batch grid.
    S2, M2, A2, B2 = 48, 384, 24, 32
    w1b = xavier_uniform(k_w1b, S2, M2, (S2, M2))
    b1b = (jax.random.uniform(k_b1b, (M2,), minval=-1.0, maxval=1.0)
           / math.sqrt(S2)).astype(jnp.float32)
    w2b = xavier_uniform(k_w2b, M2, A2, (M2, A2))
    b2b = (jax.random.uniform(k_b2b, (A2,), minval=-1.0, maxval=1.0)
           / math.sqrt(M2)).astype(jnp.float32)
    x2 = jax.random.normal(k_x2, (B2, S2), dtype=jnp.float32)

    ffn_big = make_ffn(w1b, b1b, w2b, b2b, compute_dtype=jnp.float32,
                       block_b=16, block_m=128)
    out_big = jax.block_until_ready(ffn_big(x2))
    ref_big = ffn_reference(x2, w1b, b1b, w2b, b2b, jnp.float32)
    assert out_big.shape == (B2, A2)
    assert jnp.allclose(out_big, ref_big, atol=1e-4, rtol=1e-4)

    print("KERNEL_OK")
</pallas_src>

<mosaic_0001>
module attributes {stable_mosaic.version = 11 : i64} {
  func.func @_ffn_kernel(%arg0: i32, %arg1: i32, %arg2: memref<8x32xf32, #tpu.memory_space<vmem>>, %arg3: memref<32x64xf32, #tpu.memory_space<vmem>>, %arg4: memref<1x64xf32, #tpu.memory_space<vmem>>, %arg5: memref<64x16xf32, #tpu.memory_space<vmem>>, %arg6: memref<1x16xf32, #tpu.memory_space<vmem>>, %arg7: memref<8x16xf32, #tpu.memory_space<vmem>>, %arg8: memref<8x16xf32, #tpu.memory_space<vmem>>) attributes {dimension_semantics = [#tpu.dimension_semantics<parallel>, #tpu.dimension_semantics<arbitrary>], iteration_bounds = array<i64: 1, 1>, scalar_prefetch = 0 : i64, scratch_operands = 1 : i64, tpu.core_type = #tpu.core_type<tc>, window_params = [{transform_indices = @transform_0, window_bounds = array<i64: 8, 32>}, {pipeline_mode = #tpu.pipeline_mode<synchronous>, transform_indices = @transform_1, window_bounds = array<i64: 32, 64>}, {pipeline_mode = #tpu.pipeline_mode<synchronous>, transform_indices = @transform_2, window_bounds = array<i64: 1, 64>}, {pipeline_mode = #tpu.pipeline_mode<synchronous>, transform_indices = @transform_3, window_bounds = array<i64: 64, 16>}, {pipeline_mode = #tpu.pipeline_mode<synchronous>, transform_indices = @transform_4, window_bounds = array<i64: 1, 16>}, {transform_indices = @transform_5, window_bounds = array<i64: 8, 16>}]} {
    %c0_i32 = arith.constant 0 : i32
    %0 = arith.cmpi eq, %arg1, %c0_i32 : i32
    %1 = arith.extui %0 : i1 to i32
    %c0_i32_0 = arith.constant 0 : i32
    %2 = arith.cmpi ne, %1, %c0_i32_0 : i32
    scf.if %2 {
      %cst_16 = arith.constant 0.000000e+00 : f32
      %19 = vector.broadcast %cst_16 : f32 to vector<8x16xf32>
      %c0_17 = arith.constant 0 : index
      %c0_18 = arith.constant 0 : index
      %20 = vector.load %arg8[%c0_17, %c0_18] : memref<8x16xf32, #tpu.memory_space<vmem>>, vector<8x16xf32>
      tpu.vector_store %arg8[%c0_17, %c0_18], %19 {strides = array<i32>} : memref<8x16xf32, #tpu.memory_space<vmem>>, vector<8x16xf32>,
    } else {
    }
    %c0 = arith.constant 0 : index
    %c0_1 = arith.constant 0 : index
    %3 = vector.load %arg2[%c0, %c0_1] : memref<8x32xf32, #tpu.memory_space<vmem>>, vector<8x32xf32>
    %c0_2 = arith.constant 0 : index
    %c0_3 = arith.constant 0 : index
    %4 = vector.load %arg3[%c0_2, %c0_3] : memref<32x64xf32, #tpu.memory_space<vmem>>, vector<32x64xf32>
    %cst = arith.constant dense<0.000000e+00> : vector<8x64xf32>
    %5 = tpu.matmul %3, %4, %cst {dimension_numbers = #tpu.dot_dimension_numbers<[1], [0], [0], [1], [0, 0, 1, 1], [], []>} : vector<8x32xf32>, vector<32x64xf32>, vector<8x64xf32> -> vector<8x64xf32>
    %c0_4 = arith.constant 0 : index
    %c0_5 = arith.constant 0 : index
    %6 = vector.load %arg4[%c0_4, %c0_5] : memref<1x64xf32, #tpu.memory_space<vmem>>, vector<1x64xf32>
    %7 = vector.broadcast %6 : vector<1x64xf32> to vector<8x64xf32>
    %8 = arith.addf %5, %7 : vector<8x64xf32>
    %cst_6 = arith.constant 0.000000e+00 : f32
    %9 = vector.broadcast %cst_6 : f32 to vector<8x64xf32>
    %10 = arith.maximumf %8, %9 : vector<8x64xf32>
    %c0_7 = arith.constant 0 : index
    %c0_8 = arith.constant 0 : index
    %11 = vector.load %arg8[%c0_7, %c0_8] : memref<8x16xf32, #tpu.memory_space<vmem>>, vector<8x16xf32>
    %c0_9 = arith.constant 0 : index
    %c0_10 = arith.constant 0 : index
    %12 = vector.load %arg5[%c0_9, %c0_10] : memref<64x16xf32, #tpu.memory_space<vmem>>, vector<64x16xf32>
    %cst_11 = arith.constant dense<0.000000e+00> : vector<8x16xf32>
    %13 = tpu.matmul %10, %12, %cst_11 {dimension_numbers = #tpu.dot_dimension_numbers<[1], [0], [0], [1], [0, 0, 1, 1], [], []>} : vector<8x64xf32>, vector<64x16xf32>, vector<8x16xf32> -> vector<8x16xf32>
    %14 = arith.addf %11, %13 : vector<8x16xf32>
    %c0_12 = arith.constant 0 : index
    %c0_13 = arith.constant 0 : index
    %15 = vector.load %arg8[%c0_12, %c0_13] : memref<8x16xf32, #tpu.memory_space<vmem>>, vector<8x16xf32>
    tpu.vector_store %arg8[%c0_12, %c0_13], %14 {strides = array<i32>} : memref<8x16xf32, #tpu.memory_space<vmem>>, vector<8x16xf32>,
    %c0_i32_14 = arith.constant 0 : i32
    %16 = arith.cmpi eq, %arg1, %c0_i32_14 : i32
    %17 = arith.extui %16 : i1 to i32
    %c0_i32_15 = arith.constant 0 : i32
    %18 = arith.cmpi ne, %17, %c0_i32_15 : i32
    scf.if %18 {
      %c0_16 = arith.constant 0 : index
      %c0_17 = arith.constant 0 : index
      %19 = vector.load %arg8[%c0_16, %c0_17] : memref<8x16xf32, #tpu.memory_space<vmem>>, vector<8x16xf32>
      %c0_18 = arith.constant 0 : index
      %c0_19 = arith.constant 0 : index
      %20 = vector.load %arg6[%c0_18, %c0_19] : memref<1x16xf32, #tpu.memory_space<vmem>>, vector<1x16xf32>
      %21 = vector.broadcast %20 : vector<1x16xf32> to vector<8x16xf32>
      %22 = arith.addf %19, %21 : vector<8x16xf32>
      %c0_20 = arith.constant 0 : index
      %c0_21 = arith.constant 0 : index
      %23 = vector.load %arg7[%c0_20, %c0_21] : memref<8x16xf32, #tpu.memory_space<vmem>>, vector<8x16xf32>
      tpu.vector_store %arg7[%c0_20, %c0_21], %22 {strides = array<i32>} : memref<8x16xf32, #tpu.memory_space<vmem>>, vector<8x16xf32>,
    } else {
    }
    return
  }
  func.func @transform_0(%arg0: i32, %arg1: i32) -> (i32, i32) {
    %c0_i32 = arith.constant 0 : i32
    %c0_i32_0 = arith.constant 0 : i32
    return %arg0, %c0_i32 : i32, i32
  }
  func.func @transform_1(%arg0: i32, %arg1: i32) -> (i32, i32) {
    %c0_i32 = arith.constant 0 : i32
    %c0_i32_0 = arith.constant 0 : i32
    return %c0_i32, %arg1 : i32, i32
  }
  func.func @transform_2(%arg0: i32, %arg1: i32) -> (i32, i32) {
    %c0_i32 = arith.constant 0 : i32
    %c0_i32_0 = arith.constant 0 : i32
    return %c0_i32, %arg1 : i32, i32
  }
  func.func @transform_3(%arg0: i32, %arg1: i32) -> (i32, i32) {
    %c0_i32 = arith.constant 0 : i32
    %c0_i32_0 = arith.constant 0 : i32
    return %arg1, %c0_i32 : i32, i32
  }
  func.func @transform_4(%arg0: i32, %arg1: i32) -> (i32, i32) {
    %c0_i32 = arith.constant 0 : i32
    %c0_i32_0 = arith.constant 0 : i32
    %c0_i32_1 = arith.constant 0 : i32
    return %c0_i32, %c0_i32_0 : i32, i32
  }
  func.func @transform_5(%arg0: i32, %arg1: i32) -> (i32, i32) {
    %c0_i32 = arith.constant 0 : i32
    %c0_i32_0 = arith.constant 0 : i32
    return %arg0, %c0_i32 : i32, i32
  }
}

module attributes {stable_mosaic.version = 11 : i64} {
  func.func @_ffn_kernel(%arg0: i32, %arg1: i32, %arg2: memref<8x32xf32, #tpu.memory_space<vmem>>, %arg3: memref<32x64xf32, #tpu.memory_space<vmem>>, %arg4: memref<1x64xf32, #tpu.memory_space<vmem>>, %arg5: memref<64x16xf32, #tpu.memory_space<vmem>>, %arg6: memref<1x16xf32, #tpu.memory_space<vmem>>, %arg7: memref<8x16xf32, #tpu.memory_space<vmem>>, %arg8: memref<8x16xf32, #tpu.memory_space<vmem>>) attributes {dimension_semantics = [#tpu.dimension_semantics<parallel>, #tpu.dimension_semantics<arbitrary>], iteration_bounds = array<i64: 1, 1>, scalar_prefetch = 0 : i64, scratch_operands = 1 : i64, tpu.core_type = #tpu.core_type<tc>, window_params = [{transform_indices = @transform_0, window_bounds = array<i64: 8, 32>}, {transform_indices = @transform_1, window_bounds = array<i64: 32, 64>}, {transform_indices = @transform_2, window_bounds = array<i64: 1, 64>}, {transform_indices = @transform_3, window_bounds = array<i64: 64, 16>}, {pipeline_mode = #tpu.pipeline_mode<synchronous>, transform_indices = @transform_4, window_bounds = array<i64: 1, 16>}, {transform_indices = @transform_5, window_bounds = array<i64: 8, 16>}]} {
    %c0_i32 = arith.constant 0 : i32
    %0 = arith.cmpi eq, %arg1, %c0_i32 : i32
    %1 = arith.extui %0 : i1 to i32
    %c0_i32_0 = arith.constant 0 : i32
    %2 = arith.cmpi ne, %1, %c0_i32_0 : i32
    scf.if %2 {
      %cst_16 = arith.constant 0.000000e+00 : f32
      %19 = vector.broadcast %cst_16 : f32 to vector<8x16xf32>
      %c0_17 = arith.constant 0 : index
      %c0_18 = arith.constant 0 : index
      %20 = vector.load %arg8[%c0_17, %c0_18] : memref<8x16xf32, #tpu.memory_space<vmem>>, vector<8x16xf32>
      tpu.vector_store %arg8[%c0_17, %c0_18], %19 {strides = array<i32>} : memref<8x16xf32, #tpu.memory_space<vmem>>, vector<8x16xf32>,
    } else {
    }
    %c0 = arith.constant 0 : index
    %c0_1 = arith.constant 0 : index
    %3 = vector.load %arg2[%c0, %c0_1] : memref<8x32xf32, #tpu.memory_space<vmem>>, vector<8x32xf32>
    %c0_2 = arith.constant 0 : index
    %c0_3 = arith.constant 0 : index
    %4 = vector.load %arg3[%c0_2, %c0_3] : memref<32x64xf32, #tpu.memory_space<vmem>>, vector<32x64xf32>
    %cst = arith.constant dense<0.000000e+00> : vector<8x64xf32>
    %5 = tpu.matmul %3, %4, %cst {dimension_numbers = #tpu.dot_dimension_numbers<[1], [0], [0], [1], [0, 0, 1, 1], [], []>} : vector<8x32xf32>, vector<32x64xf32>, vector<8x64xf32> -> vector<8x64xf32>
    %c0_4 = arith.constant 0 : index
    %c0_5 = arith.constant 0 : index
    %6 = vector.load %arg4[%c0_4, %c0_5] : memref<1x64xf32, #tpu.memory_space<vmem>>, vector<1x64xf32>
    %7 = vector.broadcast %6 : vector<1x64xf32> to vector<8x64xf32>
    %8 = arith.addf %5, %7 : vector<8x64xf32>
    %cst_6 = arith.constant 0.000000e+00 : f32
    %9 = vector.broadcast %cst_6 : f32 to vector<8x64xf32>
    %10 = arith.maximumf %8, %9 : vector<8x64xf32>
    %c0_7 = arith.constant 0 : index
    %c0_8 = arith.constant 0 : index
    %11 = vector.load %arg8[%c0_7, %c0_8] : memref<8x16xf32, #tpu.memory_space<vmem>>, vector<8x16xf32>
    %c0_9 = arith.constant 0 : index
    %c0_10 = arith.constant 0 : index
    %12 = vector.load %arg5[%c0_9, %c0_10] : memref<64x16xf32, #tpu.memory_space<vmem>>, vector<64x16xf32>
    %cst_11 = arith.constant dense<0.000000e+00> : vector<8x16xf32>
    %13 = tpu.matmul %10, %12, %cst_11 {dimension_numbers = #tpu.dot_dimension_numbers<[1], [0], [0], [1], [0, 0, 1, 1], [], []>} : vector<8x64xf32>, vector<64x16xf32>, vector<8x16xf32> -> vector<8x16xf32>
    %14 = arith.addf %11, %13 : vector<8x16xf32>
    %c0_12 = arith.constant 0 : index
    %c0_13 = arith.constant 0 : index
    %15 = vector.load %arg8[%c0_12, %c0_13] : memref<8x16xf32, #tpu.memory_space<vmem>>, vector<8x16xf32>
    tpu.vector_store %arg8[%c0_12, %c0_13], %14 {strides = array<i32>} : memref<8x16xf32, #tpu.memory_space<vmem>>, vector<8x16xf32>,
    %c0_i32_14 = arith.constant 0 : i32
    %16 = arith.cmpi eq, %arg1, %c0_i32_14 : i32
    %17 = arith.extui %16 : i1 to i32
    %c0_i32_15 = arith.constant 0 : i32
    %18 = arith.cmpi ne, %17, %c0_i32_15 : i32
    scf.if %18 {
      %c0_16 = arith.constant 0 : index
      %c0_17 = arith.constant 0 : index
      %19 = vector.load %arg8[%c0_16, %c0_17] : memref<8x16xf32, #tpu.memory_space<vmem>>, vector<8x16xf32>
      %c0_18 = arith.constant 0 : index
      %c0_19 = arith.constant 0 : index
      %20 = vector.load %arg6[%c0_18, %c0_19] : memref<1x16xf32, #tpu.memory_space<vmem>>, vector<1x16xf32>
      %21 = vector.broadcast %20 : vector<1x16xf32> to vector<8x16xf32>
      %22 = arith.addf %19, %21 : vector<8x16xf32>
      %c0_20 = arith.constant 0 : index
      %c0_21 = arith.constant 0 : index
      %23 = vector.load %arg7[%c0_20, %c0_21] : memref<8x16xf32, #tpu.memory_space<vmem>>, vector<8x16xf32>
      tpu.vector_store %arg7[%c0_20, %c0_21], %22 {strides = array<i32>} : memref<8x16xf32, #tpu.memory_space<vmem>>, vector<8x16xf32>,
    } else {
    }
    return
  }
  func.func @transform_0(%arg0: i32, %arg1: i32) -> (i32, i32) {
    %c0_i32 = arith.constant 0 : i32
    %c0_i32_0 = arith.constant 0 : i32
    return %arg0, %c0_i32 : i32, i32
  }
  func.func @transform_1(%arg0: i32, %arg1: i32) -> (i32, i32) {
    %c0_i32 = arith.constant 0 : i32
    %c0_i32_0 = arith.constant 0 : i32
    return %c0_i32, %arg1 : i32, i32
  }
  func.func @transform_2(%arg0: i32, %arg1: i32) -> (i32, i32) {
    %c0_i32 = arith.constant 0 : i32
    %c0_i32_0 = arith.constant 0 : i32
    return %c0_i32, %arg1 : i32, i32
  }
  func.func @transform_3(%arg0: i32, %arg1: i32) -> (i32, i32) {
    %c0_i32 = arith.constant 0 : i32
    %c0_i32_0 = arith.constant 0 : i32
    return %arg1, %c0_i32 : i32, i32
  }
  func.func @transform_4(%arg0: i32, %arg1: i32) -> (i32, i32) {
    %c0_i32 = arith.constant 0 : i32
    %c0_i32_0 = arith.constant 0 : i32
    %c0_i32_1 = arith.constant 0 : i32
    return %c0_i32, %c0_i32_0 : i32, i32
  }
  func.func @transform_5(%arg0: i32, %arg1: i32) -> (i32, i32) {
    %c0_i32 = arith.constant 0 : i32
    %c0_i32_0 = arith.constant 0 : i32
    return %arg0, %c0_i32 : i32, i32
  }
}

</mosaic_0001>

<bundles_post_ra>
// kernel: tpu_custom_call.1
= control target key start
LH: loop header
LB: loop body
LE: loop exit
PB: predicated region body
PF: predicated region fallthrough
CT: control target
= control target key end

     0   :  { %s238_s0 = inlined_call_operand.vmem [shape: f32[8,32], index: 0, kind: input, shape index: {}]   ;;  %s239_s1 = inlined_call_operand.vmem [shape: f32[32,64], index: 1, kind: input, shape index: {}]   ;;  %s240_s2 = inlined_call_operand.vmem [shape: f32[1,64], index: 2, kind: input, shape index: {}]   ;;  %s241_s3 = inlined_call_operand.vmem [shape: f32[64,16], index: 3, kind: input, shape index: {}]   ;;  %s242_s4 = inlined_call_operand.vmem [shape: f32[1,16], index: 4, kind: input, shape index: {}]   ;;  %s243_s5 = inlined_call_operand.hbm [shape: f32[8,16], index: 5, kind: output, shape index: {}]  }
   0x1   :  { %v31_v0 = vld [vmem:[%s239_s1 + $0x18] sm:$0xff]  ;;  %v30_v1 = vld [vmem:[%s239_s1 + $0x10] sm:$0xff]  ;;  %v29_v3 = vld [vmem:[%s239_s1 + $0x8] sm:$0xff] }
   0x2   :  { %52 = vmatpush.msra.mxu0 %v31_v0  ;;  %v69_v2 = vld [vmem:[%s241_s3 + $0x38] sm:$0xff]  ;;  %v68_v4 = vld [vmem:[%s241_s3 + $0x30] sm:$0xff]  ;;  %v67_v5 = vld [vmem:[%s241_s3 + $0x28] sm:$0xff] }
   0x3   :  { %82 = vmatpush.msra.mxu1 %v69_v2  ;;  %v28_v6 = vld [vmem:[%s239_s1] sm:$0xff] }
   0x4   :  { %53 = vmatpush.msra.mxu0 %v30_v1 }
   0x5   :  { %83 = vmatpush.msra.mxu1 %v68_v4 }
   0x6   :  { %10 = vsyncpa [#allocation4], 0  ;;  %54 = vmatpush.msra.mxu0 %v29_v3  ;;  %v27_v7 = vld [vmem:[%s238_s0] sm:$0xff]  ;;  %vm36_vm0 = vcmask 261120   ;;  %v65_v9 = vld [vmem:[%s241_s3 + $0x18] sm:$0xff]  ;;  %vm25_vm1 = vcmask 130048  }
   0x7   :  { %v66_v8 = vld [vmem:[%s241_s3 + $0x20] sm:$0xff]  ;;  %84 = vmatpush.msra.mxu1 %v67_v5  ;;  %v64_v10 = vld [vmem:[%s241_s3 + $0x10] sm:$0xff]  ;;  %v63_v11 = vld [vmem:[%s241_s3 + $0x8] sm:$0xff]  ;;  %v155_v13 = vmov 0.0   ;;  %vm70_vm2 = vcmask 523264   ;;  %s156_s20 = smov [#allocation3]  }
   0x8   :  { %55 = vmatpush.msra.mxu0 %v28_v6  ;;  %v62_v12 = vld [vmem:[%s241_s3] sm:$0xff]  ;;  %26 = vst.msk [vmem:[#allocation2] sm:$0xff] %vm25_vm1, %v155_v13  ;;  %s112_s21 = sshll.u32 %s156_s20, 4  ;;  %s113_s21 = int_to_ptr.vmem [resolvable:$true] %s112_s21 }
   0x9   :  { %123 = vmatmul.msk.f32.vlgmr.msra.gmra.mxu0 %vm36_vm0, %v27_v7  ;;  %85 = vmatpush.msra.mxu1 %v66_v8  ;;  %v127_v14 = vld [vmem:[%s240_s2] ss:$0 sm:$0xff]  ;;  %s114_s2 = sshll.u32 %s243_s5, 4  ;;  %s115_s2 = int_to_ptr.hbm [resolvable:$true] %s114_s2 }
   0xa   :  { %v128_v21 = vld [vmem:[%s242_s4] ss:$0 sm:$0xff] }
   0xb   :  { %86 = vmatpush.msra.mxu1 %v65_v9 }
   0xd   :  { %87 = vmatpush.msra.mxu1 %v64_v10 }
   0xf   :  { %88 = vmatpush.msra.mxu1 %v63_v11  ;;  %v61_v18 = vld [vmem:[#allocation2] sm:$0xff] }
  0x11   :  { %89 = vmatpush.msra.mxu1 %v62_v12 }
  0x86   :  { %v57_v15 = vpop.f32.mrf.mxu0 }
  0x87   :  { %v58_v16 = vadd.f32 %v127_v14, %v57_v15 }
  0x89   :  { %v60_v17 = vmax.f32 %v58_v16, 0.0 }
  0x8b   :  { %124 = vmatmul.msk.f32.vlgmr.msra.gmra.mxu1 %vm70_vm2, %v60_v17 }
 0x108   :  { %v91_v19 = vpop.f32.mrf.mxu1 }
 0x109   :  { %v94_v20 = vadd.f32 %v91_v19, %v61_v18 }
 0x10b   :  { %96 = vst.msk [vmem:[#allocation2] sm:$0xff] %vm25_vm1, %v94_v20 }
 0x112   :  { %v100_v22 = vld [vmem:[#allocation2] sm:$0xff] }
 0x113   :  { %v105_v23 = vadd.f32 %v128_v21, %v100_v22 }
 0x115   :  { %106 = vst.msk [vmem:[#allocation3] sm:$0xff] %vm25_vm1, %v105_v23 }
 0x116   :  { %117 = dma.vmem_to_hbm [thread:$0]  %s113_s21, 128, %s115_s2, [#allocation4]  }
 0x117   :  { %153 = dma.done.wait [#allocation4], 128  }
 0x118   :  { %154 = vsyncadd [#allocation4], 4294967168 }
 0x119   :  { %122 = vsyncpa [#allocation4], 1 }

// kernel: tpu_custom_call.1
= control target key start
LH: loop header
LB: loop body
LE: loop exit
PB: predicated region body
PF: predicated region fallthrough
CT: control target
= control target key end

     0   :  { %s238_s0 = inlined_call_operand.vmem [shape: f32[8,32], index: 0, kind: input, shape index: {}]   ;;  %s239_s1 = inlined_call_operand.vmem [shape: f32[32,64], index: 1, kind: input, shape index: {}]   ;;  %s240_s2 = inlined_call_operand.vmem [shape: f32[1,64], index: 2, kind: input, shape index: {}]   ;;  %s241_s3 = inlined_call_operand.vmem [shape: f32[64,16], index: 3, kind: input, shape index: {}]   ;;  %s242_s4 = inlined_call_operand.vmem [shape: f32[1,16], index: 4, kind: input, shape index: {}]   ;;  %s243_s5 = inlined_call_operand.hbm [shape: f32[8,16], index: 5, kind: output, shape index: {}]  }
   0x1   :  { %v31_v0 = vld [vmem:[%s239_s1 + $0x18] sm:$0xff]  ;;  %v30_v1 = vld [vmem:[%s239_s1 + $0x10] sm:$0xff]  ;;  %v29_v3 = vld [vmem:[%s239_s1 + $0x8] sm:$0xff] }
   0x2   :  { %52 = vmatpush.msra.mxu0 %v31_v0  ;;  %v69_v2 = vld [vmem:[%s241_s3 + $0x38] sm:$0xff]  ;;  %v68_v4 = vld [vmem:[%s241_s3 + $0x30] sm:$0xff]  ;;  %v67_v5 = vld [vmem:[%s241_s3 + $0x28] sm:$0xff] }
   0x3   :  { %82 = vmatpush.msra.mxu1 %v69_v2  ;;  %v28_v6 = vld [vmem:[%s239_s1] sm:$0xff] }
   0x4   :  { %53 = vmatpush.msra.mxu0 %v30_v1 }
   0x5   :  { %83 = vmatpush.msra.mxu1 %v68_v4 }
   0x6   :  { %10 = vsyncpa [#allocation4], 0  ;;  %54 = vmatpush.msra.mxu0 %v29_v3  ;;  %v27_v7 = vld [vmem:[%s238_s0] sm:$0xff]  ;;  %vm36_vm0 = vcmask 261120   ;;  %v65_v9 = vld [vmem:[%s241_s3 + $0x18] sm:$0xff]  ;;  %vm25_vm1 = vcmask 130048  }
   0x7   :  { %v66_v8 = vld [vmem:[%s241_s3 + $0x20] sm:$0xff]  ;;  %84 = vmatpush.msra.mxu1 %v67_v5  ;;  %v64_v10 = vld [vmem:[%s241_s3 + $0x10] sm:$0xff]  ;;  %v63_v11 = vld [vmem:[%s241_s3 + $0x8] sm:$0xff]  ;;  %v155_v13 = vmov 0.0   ;;  %vm70_vm2 = vcmask 523264   ;;  %s156_s20 = smov [#allocation3]  }
   0x8   :  { %55 = vmatpush.msra.mxu0 %v28_v6  ;;  %v62_v12 = vld [vmem:[%s241_s3] sm:$0xff]  ;;  %26 = vst.msk [vmem:[#allocation2] sm:$0xff] %vm25_vm1, %v155_v13  ;;  %s112_s21 = sshll.u32 %s156_s20, 4  ;;  %s113_s21 = int_to_ptr.vmem [resolvable:$true] %s112_s21 }
   0x9   :  { %123 = vmatmul.msk.f32.vlgmr.msra.gmra.mxu0 %vm36_vm0, %v27_v7  ;;  %85 = vmatpush.msra.mxu1 %v66_v8  ;;  %v127_v14 = vld [vmem:[%s240_s2] ss:$0 sm:$0xff]  ;;  %s114_s2 = sshll.u32 %s243_s5, 4  ;;  %s115_s2 = int_to_ptr.hbm [resolvable:$true] %s114_s2 }
   0xa   :  { %v128_v21 = vld [vmem:[%s242_s4] ss:$0 sm:$0xff] }
   0xb   :  { %86 = vmatpush.msra.mxu1 %v65_v9 }
   0xd   :  { %87 = vmatpush.msra.mxu1 %v64_v10 }
   0xf   :  { %88 = vmatpush.msra.mxu1 %v63_v11  ;;  %v61_v18 = vld [vmem:[#allocation2] sm:$0xff] }
  0x11   :  { %89 = vmatpush.msra.mxu1 %v62_v12 }
  0x86   :  { %v57_v15 = vpop.f32.mrf.mxu0 }
  0x87   :  { %v58_v16 = vadd.f32 %v127_v14, %v57_v15 }
  0x89   :  { %v60_v17 = vmax.f32 %v58_v16, 0.0 }
  0x8b   :  { %124 = vmatmul.msk.f32.vlgmr.msra.gmra.mxu1 %vm70_vm2, %v60_v17 }
 0x108   :  { %v91_v19 = vpop.f32.mrf.mxu1 }
 0x109   :  { %v94_v20 = vadd.f32 %v91_v19, %v61_v18 }
 0x10b   :  { %96 = vst.msk [vmem:[#allocation2] sm:$0xff] %vm25_vm1, %v94_v20 }
 0x112   :  { %v100_v22 = vld [vmem:[#allocation2] sm:$0xff] }
 0x113   :  { %v105_v23 = vadd.f32 %v128_v21, %v100_v22 }
 0x115   :  { %106 = vst.msk [vmem:[#allocation3] sm:$0xff] %vm25_vm1, %v105_v23 }
 0x116   :  { %117 = dma.vmem_to_hbm [thread:$0]  %s113_s21, 128, %s115_s2, [#allocation4]  }
 0x117   :  { %153 = dma.done.wait [#allocation4], 128  }
 0x118   :  { %154 = vsyncadd [#allocation4], 4294967168 }
 0x119   :  { %122 = vsyncpa [#allocation4], 1 }

</bundles_post_ra>
